<compile_context>
chip_gen: v6e
topology: v6e:2x2x1
jax: 0.10.0
libtpu: 0.0.40
codegen_flags: <defaults>
</compile_context>

<pallas_src>
import jax
import jax.numpy as jnp
from jax.experimental import pallas as pl
from jax.experimental.pallas import tpu as pltpu

# ----------------------------- config ---------------------------------------
VOCAB_SIZE = 32
TYPE_VOCAB_SIZE = 2
HIDDEN_SIZE = 128
MAX_POSITION_EMBEDDINGS = 64
PAD_TOKEN_ID = 1
LAYER_NORM_EPS = 1e-12
HIDDEN_DROPOUT_PROB = 0.1  # dropout is identity at inference time

BATCH = 2
SEQ = 8

TOK = 16  # tokens per grid step; multiple of 8 so the (TOK, H) tile is (8,128)-aligned


# ----------------------------- kernel ---------------------------------------
def _emb_ln_kernel(ids_ref, tts_ref, word_ref, type_ref, gamma_ref, beta_ref,
                   out_ref):
    # ids_ref / tts_ref: (TOK, 1) int32 token ids / token-type ids
    # word_ref: (VOCAB, H) resident table; type_ref: (TYPE_VOCAB, H) resident
    # gamma_ref / beta_ref: (1, H); out_ref: (TOK, H)
    tok = ids_ref.shape[0]
    vocab = word_ref.shape[0]

    ids = ids_ref[...]                                  # (TOK, 1)
    tts = tts_ref[...]                                  # (TOK, 1)

    # --- word-embedding gather: one-hot matmul on the MXU (exact for 0/1) ---
    iota = jax.lax.broadcasted_iota(jnp.int32, (tok, vocab), 1)
    onehot = (iota == ids).astype(jnp.float32)          # (TOK, VOCAB)
    word = jnp.dot(onehot, word_ref[...],
                   preferred_element_type=jnp.float32)  # (TOK, H)

    # --- token-type gather: only 2 rows -> VPU select (no DMA, no matmul) ---
    trows = type_ref[...].astype(jnp.float32)           # (2, H)
    row0 = trows[0:1, :]                                # (1, H)
    row1 = trows[1:2, :]                                # (1, H)
    tok_type = jnp.where(tts == 0, row0, row1)          # (TOK, H)

    # --- add + LayerNorm ---
    x = word + tok_type
    mean = jnp.mean(x, axis=-1, keepdims=True)
    var = jnp.mean((x - mean) * (x - mean), axis=-1, keepdims=True)
    y = (x - mean) * jax.lax.rsqrt(var + LAYER_NORM_EPS)
    out_ref[...] = (y * gamma_ref[...] + beta_ref[...]).astype(out_ref.dtype)


def embeddings_forward(input_ids, token_type_ids, word_emb, type_emb, gamma, beta):
    """input_ids, token_type_ids: (B, S) int32.  Returns (B, S, H) float32."""
    B, S = input_ids.shape
    V, H = word_emb.shape
    TV = type_emb.shape[0]

    n = B * S
    n_pad = pl.cdiv(n, TOK) * TOK
    pad = n_pad - n

    ids_flat = input_ids.reshape(-1).astype(jnp.int32)
    tts_flat = token_type_ids.reshape(-1).astype(jnp.int32)
    if pad:
        ids_flat = jnp.concatenate([ids_flat, jnp.zeros((pad,), jnp.int32)])
        tts_flat = jnp.concatenate([tts_flat, jnp.zeros((pad,), jnp.int32)])
    ids_2d = ids_flat.reshape(n_pad, 1)
    tts_2d = tts_flat.reshape(n_pad, 1)

    grid = (n_pad // TOK,)

    out_flat = pl.pallas_call(
        _emb_ln_kernel,
        grid=grid,
        in_specs=[
            pl.BlockSpec((TOK, 1), lambda i: (i, 0)),   # token ids (per tile)
            pl.BlockSpec((TOK, 1), lambda i: (i, 0)),   # token-type ids
            pl.BlockSpec((V, H), lambda i: (0, 0)),     # whole word table, resident
            pl.BlockSpec((TV, H), lambda i: (0, 0)),    # whole type table, resident
            pl.BlockSpec((1, H), lambda i: (0, 0)),     # gamma
            pl.BlockSpec((1, H), lambda i: (0, 0)),     # beta
        ],
        out_specs=pl.BlockSpec((TOK, H), lambda i: (i, 0)),
        out_shape=jax.ShapeDtypeStruct((n_pad, H), jnp.float32),
        compiler_params=pltpu.CompilerParams(
            dimension_semantics=("parallel",)),
    )(ids_2d, tts_2d, word_emb, type_emb,
      gamma.reshape(1, H), beta.reshape(1, H))

    # dropout(p=HIDDEN_DROPOUT_PROB) is identity at inference time.
    # TODO(synk): position_ids are computed in the PyTorch forward but never
    # used (this module has no position_embeddings table), so they are omitted.
    return out_flat[:n].reshape(B, S, H)


# ----------------------------- reference ------------------------------------
def embeddings_reference(input_ids, token_type_ids, word_emb, type_emb, gamma, beta):
    x = word_emb[input_ids] + type_emb[token_type_ids]
    mean = jnp.mean(x, axis=-1, keepdims=True)
    var = jnp.mean((x - mean) ** 2, axis=-1, keepdims=True)
    y = (x - mean) * jax.lax.rsqrt(var + LAYER_NORM_EPS)
    return y * gamma + beta


# ----------------------------- main ------------------------------------------
if __name__ == "__main__":
    key = jax.random.PRNGKey(0)
    k_w, k_t, k_ids = jax.random.split(key, 3)

    # deterministic parameter init (shapes from the module's __init__)
    word_emb = jax.random.normal(k_w, (VOCAB_SIZE, HIDDEN_SIZE), jnp.float32) * 0.02
    # nn.Embedding(padding_idx=pad_token_id) zeroes the pad row
    word_emb = word_emb.at[PAD_TOKEN_ID].set(0.0)
    type_emb = jax.random.normal(k_t, (TYPE_VOCAB_SIZE, HIDDEN_SIZE), jnp.float32) * 0.02
    gamma = jnp.ones((HIDDEN_SIZE,), jnp.float32)
    beta = jnp.zeros((HIDDEN_SIZE,), jnp.float32)

    # example inputs (include a pad token to exercise padding_idx row)
    input_ids = jax.random.randint(k_ids, (BATCH, SEQ), 2, VOCAB_SIZE, jnp.int32)
    input_ids = input_ids.at[0, -1].set(PAD_TOKEN_ID)
    # buffered token_type_ids default to zeros (as in the module)
    token_type_ids = jnp.zeros((BATCH, SEQ), jnp.int32)

    out = embeddings_forward(input_ids, token_type_ids,
                             word_emb, type_emb, gamma, beta)
    out = jax.block_until_ready(out)

    ref = embeddings_reference(input_ids, token_type_ids,
                               word_emb, type_emb, gamma, beta)
    assert out.shape == (BATCH, SEQ, HIDDEN_SIZE)
    assert jnp.allclose(out, ref, atol=1e-5, rtol=1e-5)

    print("KERNEL_OK")
</pallas_src>

<mosaic_0001>
module attributes {stable_mosaic.version = 11 : i64} {
  func.func @_emb_ln_kernel(%arg0: i32, %arg1: memref<16x1xi32, #tpu.memory_space<vmem>>, %arg2: memref<16x1xi32, #tpu.memory_space<vmem>>, %arg3: memref<32x128xf32, #tpu.memory_space<vmem>>, %arg4: memref<2x128xf32, #tpu.memory_space<vmem>>, %arg5: memref<1x128xf32, #tpu.memory_space<vmem>>, %arg6: memref<1x128xf32, #tpu.memory_space<vmem>>, %arg7: memref<16x128xf32, #tpu.memory_space<vmem>>) attributes {dimension_semantics = [#tpu.dimension_semantics<parallel>], iteration_bounds = array<i64: 1>, scalar_prefetch = 0 : i64, scratch_operands = 0 : i64, tpu.core_type = #tpu.core_type<tc>, window_params = [{transform_indices = @transform_0, window_bounds = array<i64: 16, 1>}, {transform_indices = @transform_1, window_bounds = array<i64: 16, 1>}, {pipeline_mode = #tpu.pipeline_mode<synchronous>, transform_indices = @transform_2, window_bounds = array<i64: 32, 128>}, {pipeline_mode = #tpu.pipeline_mode<synchronous>, transform_indices = @transform_3, window_bounds = array<i64: 2, 128>}, {pipeline_mode = #tpu.pipeline_mode<synchronous>, transform_indices = @transform_4, window_bounds = array<i64: 1, 128>}, {pipeline_mode = #tpu.pipeline_mode<synchronous>, transform_indices = @transform_5, window_bounds = array<i64: 1, 128>}, {transform_indices = @transform_6, window_bounds = array<i64: 16, 128>}]} {
    %c0 = arith.constant 0 : index
    %c0_0 = arith.constant 0 : index
    %0 = vector.load %arg1[%c0, %c0_0] : memref<16x1xi32, #tpu.memory_space<vmem>>, vector<16x1xi32>
    %c0_1 = arith.constant 0 : index
    %c0_2 = arith.constant 0 : index
    %1 = vector.load %arg2[%c0_1, %c0_2] : memref<16x1xi32, #tpu.memory_space<vmem>>, vector<16x1xi32>
    %2 = tpu.iota {dimensions = array<i32: 1>} : vector<16x32xi32>
    %3 = vector.broadcast %0 : vector<16x1xi32> to vector<16x32xi32>
    %4 = arith.cmpi eq, %2, %3 : vector<16x32xi32>
    %5 = arith.extui %4 : vector<16x32xi1> to vector<16x32xi32>
    %6 = arith.sitofp %5 : vector<16x32xi32> to vector<16x32xf32>
    %c0_3 = arith.constant 0 : index
    %c0_4 = arith.constant 0 : index
    %7 = vector.load %arg3[%c0_3, %c0_4] : memref<32x128xf32, #tpu.memory_space<vmem>>, vector<32x128xf32>
    %cst = arith.constant dense<0.000000e+00> : vector<16x128xf32>
    %8 = tpu.matmul %6, %7, %cst {dimension_numbers = #tpu.dot_dimension_numbers<[1], [0], [0], [1], [0, 0, 1, 1], [], []>} : vector<16x32xf32>, vector<32x128xf32>, vector<16x128xf32> -> vector<16x128xf32>
    %c0_5 = arith.constant 0 : index
    %c0_6 = arith.constant 0 : index
    %9 = vector.load %arg4[%c0_5, %c0_6] : memref<2x128xf32, #tpu.memory_space<vmem>>, vector<2x128xf32>
    %10 = vector.extract_strided_slice %9 {offsets = [0, 0], sizes = [1, 128], strides = [1, 1]} : vector<2x128xf32> to vector<1x128xf32>
    %11 = vector.extract_strided_slice %9 {offsets = [1, 0], sizes = [1, 128], strides = [1, 1]} : vector<2x128xf32> to vector<1x128xf32>
    %c0_i32 = arith.constant 0 : i32
    %12 = vector.broadcast %c0_i32 : i32 to vector<16x1xi32>
    %13 = arith.cmpi eq, %1, %12 : vector<16x1xi32>
    %14 = vector.shape_cast %13 : vector<16x1xi1> to vector<16x1xi1>
    %15 = vector.broadcast %14 : vector<16x1xi1> to vector<16x128xi1>
    %16 = vector.shape_cast %10 : vector<1x128xf32> to vector<1x128xf32>
    %17 = vector.broadcast %16 : vector<1x128xf32> to vector<16x128xf32>
    %18 = vector.shape_cast %11 : vector<1x128xf32> to vector<1x128xf32>
    %19 = vector.broadcast %18 : vector<1x128xf32> to vector<16x128xf32>
    %20 = arith.select %15, %17, %19 : vector<16x128xi1>, vector<16x128xf32>
    %21 = arith.addf %8, %20 : vector<16x128xf32>
    %cst_7 = arith.constant dense<0.000000e+00> : vector<16xf32>
    %22 = vector.multi_reduction <add>, %21, %cst_7 [1] : vector<16x128xf32> to vector<16xf32>
    %23 = vector.shape_cast %22 : vector<16xf32> to vector<16x1xf32>
    %cst_8 = arith.constant 1.280000e+02 : f32
    %24 = vector.broadcast %cst_8 : f32 to vector<16x1xf32>
    %25 = arith.divf %23, %24 : vector<16x1xf32>
    %26 = vector.broadcast %25 : vector<16x1xf32> to vector<16x128xf32>
    %27 = arith.subf %21, %26 : vector<16x128xf32>
    %28 = vector.broadcast %25 : vector<16x1xf32> to vector<16x128xf32>
    %29 = arith.subf %21, %28 : vector<16x128xf32>
    %30 = arith.mulf %27, %29 : vector<16x128xf32>
    %cst_9 = arith.constant dense<0.000000e+00> : vector<16xf32>
    %31 = vector.multi_reduction <add>, %30, %cst_9 [1] : vector<16x128xf32> to vector<16xf32>
    %32 = vector.shape_cast %31 : vector<16xf32> to vector<16x1xf32>
    %cst_10 = arith.constant 1.280000e+02 : f32
    %33 = vector.broadcast %cst_10 : f32 to vector<16x1xf32>
    %34 = arith.divf %32, %33 : vector<16x1xf32>
    %35 = vector.broadcast %25 : vector<16x1xf32> to vector<16x128xf32>
    %36 = arith.subf %21, %35 : vector<16x128xf32>
    %cst_11 = arith.constant 9.99999996E-13 : f32
    %37 = vector.broadcast %cst_11 : f32 to vector<16x1xf32>
    %38 = arith.addf %34, %37 : vector<16x1xf32>
    %39 = math.rsqrt %38 : vector<16x1xf32>
    %40 = vector.broadcast %39 : vector<16x1xf32> to vector<16x128xf32>
    %41 = arith.mulf %36, %40 : vector<16x128xf32>
    %c0_12 = arith.constant 0 : index
    %c0_13 = arith.constant 0 : index
    %42 = vector.load %arg5[%c0_12, %c0_13] : memref<1x128xf32, #tpu.memory_space<vmem>>, vector<1x128xf32>
    %43 = vector.broadcast %42 : vector<1x128xf32> to vector<16x128xf32>
    %44 = arith.mulf %41, %43 : vector<16x128xf32>
    %c0_14 = arith.constant 0 : index
    %c0_15 = arith.constant 0 : index
    %45 = vector.load %arg6[%c0_14, %c0_15] : memref<1x128xf32, #tpu.memory_space<vmem>>, vector<1x128xf32>
    %46 = vector.broadcast %45 : vector<1x128xf32> to vector<16x128xf32>
    %47 = arith.addf %44, %46 : vector<16x128xf32>
    %c0_16 = arith.constant 0 : index
    %c0_17 = arith.constant 0 : index
    %48 = vector.load %arg7[%c0_16, %c0_17] : memref<16x128xf32, #tpu.memory_space<vmem>>, vector<16x128xf32>
    tpu.vector_store %arg7[%c0_16, %c0_17], %47 {strides = array<i32>} : memref<16x128xf32, #tpu.memory_space<vmem>>, vector<16x128xf32>,
    return
  }
  func.func @transform_0(%arg0: i32) -> (i32, i32) {
    %c0_i32 = arith.constant 0 : i32
    %c0_i32_0 = arith.constant 0 : i32
    return %arg0, %c0_i32 : i32, i32
  }
  func.func @transform_1(%arg0: i32) -> (i32, i32) {
    %c0_i32 = arith.constant 0 : i32
    %c0_i32_0 = arith.constant 0 : i32
    return %arg0, %c0_i32 : i32, i32
  }
  func.func @transform_2(%arg0: i32) -> (i32, i32) {
    %c0_i32 = arith.constant 0 : i32
    %c0_i32_0 = arith.constant 0 : i32
    %c0_i32_1 = arith.constant 0 : i32
    return %c0_i32, %c0_i32_0 : i32, i32
  }
  func.func @transform_3(%arg0: i32) -> (i32, i32) {
    %c0_i32 = arith.constant 0 : i32
    %c0_i32_0 = arith.constant 0 : i32
    %c0_i32_1 = arith.constant 0 : i32
    return %c0_i32, %c0_i32_0 : i32, i32
  }
  func.func @transform_4(%arg0: i32) -> (i32, i32) {
    %c0_i32 = arith.constant 0 : i32
    %c0_i32_0 = arith.constant 0 : i32
    %c0_i32_1 = arith.constant 0 : i32
    return %c0_i32, %c0_i32_0 : i32, i32
  }
  func.func @transform_5(%arg0: i32) -> (i32, i32) {
    %c0_i32 = arith.constant 0 : i32
    %c0_i32_0 = arith.constant 0 : i32
    %c0_i32_1 = arith.constant 0 : i32
    return %c0_i32, %c0_i32_0 : i32, i32
  }
  func.func @transform_6(%arg0: i32) -> (i32, i32) {
    %c0_i32 = arith.constant 0 : i32
    %c0_i32_0 = arith.constant 0 : i32
    return %arg0, %c0_i32 : i32, i32
  }
}

</mosaic_0001>

<bundles_post_ra>
// kernel: tpu_custom_call.1
= control target key start
LH: loop header
LB: loop body
LE: loop exit
PB: predicated region body
PF: predicated region fallthrough
CT: control target
= control target key end

     0   :  { %v266_v2 = vmov 0   ;;  %s342_s0 = inlined_call_operand.vmem [shape: s32[16,1], index: 0, kind: input, shape index: {}]   ;;  %s343_s1 = inlined_call_operand.vmem [shape: s32[16,1], index: 1, kind: input, shape index: {}]   ;;  %s344_s2 = inlined_call_operand.vmem [shape: f32[32,128], index: 2, kind: input, shape index: {}]   ;;  %s345_s3 = inlined_call_operand.vmem [shape: f32[2,128], index: 3, kind: input, shape index: {}]   ;;  %s346_s4 = inlined_call_operand.vmem [shape: f32[1,128], index: 4, kind: input, shape index: {}]   ;;  %s347_s5 = inlined_call_operand.vmem [shape: f32[1,128], index: 5, kind: input, shape index: {}]   ;;  %s348_s6 = inlined_call_operand.hbm [shape: f32[16,128], index: 6, kind: output, shape index: {}]  }
   0x1   :  { %v24_v0 = vld [vmem:[%s342_s0] sm:$0xff]  ;;  %v45_v1 = vld [vmem:[%s344_s2 + $0x18] sm:$0xff]  ;;  %238 = vset.pattern.permute.xlu0 %v266_v2  ;;  %v44_v3 = vld [vmem:[%s344_s2 + $0x10] sm:$0xff] }
   0x2   :  { %222 = vmatprep.subr.mxu0 %v45_v1  ;;  %31 = vperm.xlu0 %238, %v24_v0   ;;  %v43_v4 = vld [vmem:[%s344_s2 + $0x8] sm:$0xff] }
   0x3   :  { %223 = vmatpush3.msra.mxu0 %v45_v1 }
   0x4   :  { %11 = vsyncpa [#allocation3], 0  ;;  %v25_v5 = vld [vmem:[%s342_s0 + $0x8] sm:$0xff]  ;;  %224 = vmatprep.subr.mxu0 %v44_v3  ;;  %239 = vset.pattern.permute.xlu1 %v266_v2  ;;  %v42_v6 = vld [vmem:[%s344_s2] sm:$0xff]  ;;  %v28_v11 = vlaneseq  ;;  %vm69_vm2 = vcmask 261120   ;;  %v267_v14 = vmov 0.0  }
   0x5   :  { %225 = vmatpush3.msra.mxu0 %v44_v3  ;;  %v26_v7 = vld [vmem:[%s343_s1] sm:$0xff]  ;;  %v27_v8 = vld [vmem:[%s343_s1 + $0x8] sm:$0xff]  ;;  %s268_s15 = smov [#allocation2]  }
   0x6   :  { %226 = vmatprep.subr.mxu0 %v43_v4  ;;  %vm47_vm0 = vcmp.eq.s32.totalorder %v26_v7, 0  ;;  %vm48_vm1 = vcmp.eq.s32.totalorder %v27_v8, 0  ;;  %34 = vperm.xlu0 %238, %v25_v5   ;;  %v29_v12 = vand.u32 127, %v28_v11  ;;  %v60_v18 = vshrl.u32 %v28_v11, 7  ;;  %v46_v22 = vld [vmem:[%s345_s3] sm:$0x3] }
   0x7   :  { %227 = vmatpush3.msra.mxu0 %v43_v4  ;;  %v49_v9 = vsel %vm47_vm0, 1, %v266_v2  ;;  %v50_v10 = vsel %vm48_vm1, 1, %v266_v2  ;;  %v214_v47 = vld [vmem:[%s346_s4] ss:$0 sm:$0xff]  ;;  %s199_s16 = sshll.u32 %s268_s15, 4  ;;  %s200_s16 = int_to_ptr.vmem [resolvable:$true] %s199_s16 }
   0x8   :  { %228 = vmatprep.subr.mxu0 %v42_v6  ;;  %52 = vperm.xlu1 %239, %v49_v9   ;;  %v61_v20 = vsub.s32 0, %v60_v18  ;;  %v65_v21 = vsub.s32 1, %v60_v18  ;;  %v215_v49 = vld [vmem:[%s347_s5] ss:$0 sm:$0xff]  ;;  %s244_s17 = scalar_lea.vmem %s200_s16, 256  ;;  %p249_p1 = scmp.lt.s32.totalorder %s200_s16, %s200_s16 }
   0x9   :  { %229 = vmatpush3.msra.mxu0 %v42_v6  ;;  %p245_p0 = scmp.ne.s32.totalorder %s200_s16, %s244_s17  ;;  %p250_p2 = scmp.lt.s32.totalorder %s244_s17, %s244_s17 }
   0xa   :  { %v62_v24 = vrot.slane %v46_v22, %v61_v20  ;;  %v66_v25 = vrot.slane %v46_v22, %v65_v21 }
   0xb   :  { %p251_p3 = por %p250_p2, %p249_p1 }
   0xc   :  { %55 = vperm.xlu1 %239, %v50_v10  }
   0xd   :  { %p252_p4 = pnand %p251_p3, %p245_p0 }
  0x7d   :  { %v32_v13 = vpop.permute.xlu0 %31 }
  0x7e   :  { %vm36_vm3 = vcmp.eq.s32.totalorder %v29_v12, %v32_v13 }
  0x7f   :  { %v210_v15 = vsel %vm36_vm3, 1.0, %v267_v14 }
  0x80   :  { %230 = vmatprep.mubr.msk.f32.mxu0 %vm69_vm2, %v210_v15 }
  0x81   :  { %v35_v16 = vpop.permute.xlu0 %34 }
  0x82   :  { %vm37_vm4 = vcmp.eq.s32.totalorder %v29_v12, %v35_v16 }
  0x83   :  { %v211_v17 = vsel %vm37_vm4, 1.0, %v267_v14  ;;  %v53_v19 = vpop.permute.xlu1 %52 }
  0x84   :  { %231 = vmatmul.mubr.msk.f32.vlgmr.msra.gmra.mxu0 %vm69_vm2, %v211_v17  ;;  %vm57_vm6 = vcmp.eq.s32.totalorder %v53_v19, 1 }
  0x85   :  { %v67_v28 = vsel %vm57_vm6, %v62_v24, %v66_v25 }
  0x87   :  { %v56_v23 = vpop.permute.xlu1 %55 }
  0x88   :  { %vm58_vm5 = vcmp.eq.s32.totalorder %v56_v23, 1 }
  0x89   :  { %v68_v26 = vsel %vm58_vm5, %v62_v24, %v66_v25 }
 0x144   :  { %v232_v27 = vpop.f32.mrf.mxu0 }
 0x145   :  { %v148_v29 = vadd.f32 %v232_v27, %v68_v26 }
 0x146   :  { %v142_v30 = vpop.f32.mrf.mxu0 }
 0x147   :  { %v143_v31 = vadd.f32 %v142_v30, %v67_v28  ;;  %153 = vadd.xlane.f32.xlu1 %v148_v29 }
 0x149   :  { %151 = vadd.xlane.f32.xlu0 %v143_v31 }
 0x1d0   :  { %v154_v32 = vpop.xlane.xlu1 %153 }
 0x1d1   :  { %v157_v34 = vmul.f32 0.0078125, %v154_v32 }
 0x1d2   :  { %v152_v33 = vpop.xlane.xlu0 %151 }
 0x1d3   :  { %v156_v35 = vmul.f32 0.0078125, %v152_v33  ;;  %v159_v37 = vsub.f32 %v148_v29, %v157_v34 }
 0x1d5   :  { %v158_v36 = vsub.f32 %v143_v31, %v156_v35  ;;  %v161_v39 = vmul.f32 %v159_v37, %v159_v37 }
 0x1d7   :  { %v160_v38 = vmul.f32 %v158_v36, %v158_v36 }
 0x1d9   :  { %162 = vadd.xlane.f32.xlu0 %v160_v38 }
 0x1dd   :  { %164 = vadd.xlane.f32.xlu0 %v161_v39 }
 0x262   :  { %v163_v40 = vpop.xlane.xlu0 %162 }
 0x263   :  { %v166_v41 = vmul.f32 0.0078125, %v163_v40 }
 0x265   :  { %v168_v42 = vadd.f32 1e-12, %v166_v41 }
 0x266   :  { %v165_v43 = vpop.xlane.xlu0 %164 }
 0x267   :  { %240 = vrsqrt.f32 %v168_v42  ;;  %v167_v44 = vmul.f32 0.0078125, %v165_v43 }
 0x269   :  { %v169_v45 = vadd.f32 1e-12, %v167_v44 }
 0x26b   :  { %242 = vrsqrt.f32 %v169_v45 }
 0x274   :  { %v241_v46 = vpop.eup %240 }
 0x275   :  { %v172_v48 = vmul.f32 %v241_v46, %v158_v36 }
 0x277   :  { %v181_v50 = vmul.f32 %v214_v47, %v172_v48 }
 0x278   :  { %v243_v51 = vpop.eup %242 }
 0x279   :  { %v173_v52 = vmul.f32 %v243_v51, %v159_v37  ;;  %v190_v53 = vadd.f32 %v215_v49, %v181_v50 }
 0x27b   :  { %v182_v54 = vmul.f32 %v214_v47, %v173_v52  ;;  %192 = vst [vmem:[#allocation2] sm:$0xff] %v190_v53 }
 0x27d   :  { %v191_v55 = vadd.f32 %v215_v49, %v182_v54 }
 0x27f   :  { %193 = vst [vmem:[#allocation2 + $0x8] sm:$0xff] %v191_v55 }
 0x280   :  { %255 = shalt.err (!%p252_p4)
}
 0x281   :  { %s269_s4 = smov 128   ;;  %s270_s5 = smov 8  }
 0x282   :  { %205 = dma.vmem_to_hbm [thread:$0]  %s200_s16, 256, %s348_s6, [#allocation3], %s269_s4, %s269_s4, %s270_s5  }
 0x283   :  { %264 = dma.done.wait [#allocation3], 256  }
 0x284   :  { %265 = vsyncadd [#allocation3], 4294967040 }
 0x285   :  { %209 = vsyncpa [#allocation3], 1 }

</bundles_post_ra>
